<compile_context>
chip_gen: v6e
topology: v6e:2x2x1
jax: 0.10.0
libtpu: 0.0.40
codegen_flags: <defaults>
</compile_context>

<pallas_src>
import functools

import jax
import jax.numpy as jnp
from jax import lax
from jax.experimental import pallas as pl
from jax.experimental.pallas import tpu as pltpu

_MASK_VALUE = -1e30


def _round_up(a, b):
    return (a + b - 1) // b * b


def _pad2(a, rows, cols):
    pr, pc = rows - a.shape[0], cols - a.shape[1]
    if pr or pc:
        a = jnp.pad(a, ((0, pr), (0, pc)))
    return a


# --------------------------------------------------------------------------
# Kernel 1: fused Q/K/V projection (Q pre-scaled by 1/sqrt(embed)).
# --------------------------------------------------------------------------
def qkv_proj_kernel(scale,
                    x_ref, wq_ref, bq_ref, wk_ref, bk_ref, wv_ref, bv_ref,
                    q_ref, k_ref, v_ref):
    x = x_ref[...]
    q = jnp.dot(x, wq_ref[...], preferred_element_type=jnp.float32)
    q = q + bq_ref[...].astype(jnp.float32)
    k = jnp.dot(x, wk_ref[...], preferred_element_type=jnp.float32)
    k = k + bk_ref[...].astype(jnp.float32)
    v = jnp.dot(x, wv_ref[...], preferred_element_type=jnp.float32)
    v = v + bv_ref[...].astype(jnp.float32)
    q_ref[...] = (q * scale).astype(q_ref.dtype)   # fold 1/sqrt(E) into Q
    k_ref[...] = k.astype(k_ref.dtype)
    v_ref[...] = v.astype(v_ref.dtype)


# --------------------------------------------------------------------------
# Kernel 2: flash-attention online softmax + fused output projection.
# --------------------------------------------------------------------------
def flash_attn_kernel(seq_len, kv_tile, needs_mask,
                      q_ref, k_ref, v_ref, wo_ref, bo_ref, o_ref,
                      m_sc, l_sc, acc_sc):
    ki = pl.program_id(1)

    @pl.when(ki == 0)
    def _():
        m_sc[...] = jnp.full(m_sc.shape, -jnp.inf, jnp.float32)
        l_sc[...] = jnp.zeros(l_sc.shape, jnp.float32)
        acc_sc[...] = jnp.zeros(acc_sc.shape, jnp.float32)

    q = q_ref[...]                      # [tq, E_p]  (already scaled)
    k = k_ref[...]                      # [tk, E_p]
    # energy tile = q @ k^T expressed as a transposed contraction (no XLU
    # transpose / no materialized K^T copy).
    s = lax.dot_general(q, k, dimension_numbers=(((1,), (1,)), ((), ())),
                        preferred_element_type=jnp.float32)   # [tq, tk]

    if needs_mask:
        tq, tk = s.shape
        key_idx = ki * kv_tile + lax.broadcasted_iota(jnp.int32, (tq, tk), 1)
        s = jnp.where(key_idx < seq_len, s, _MASK_VALUE)

    m_prev = m_sc[...]
    m_new = jnp.maximum(m_prev, jnp.max(s, axis=-1, keepdims=True))
    alpha = jnp.exp(m_prev - m_new)
    p = jnp.exp(s - m_new)
    l_sc[...] = alpha * l_sc[...] + jnp.sum(p, axis=-1, keepdims=True)
    acc_sc[...] = alpha * acc_sc[...] + jnp.dot(
        p.astype(v_ref.dtype), v_ref[...], preferred_element_type=jnp.float32)
    m_sc[...] = m_new

    @pl.when(ki == pl.num_programs(1) - 1)
    def _():
        ctx = acc_sc[...] * pl.reciprocal(l_sc[...], approx=True)
        out = jnp.dot(ctx.astype(wo_ref.dtype), wo_ref[...],
                      preferred_element_type=jnp.float32)
        out = out + bo_ref[...].astype(jnp.float32)
        o_ref[...] = out.astype(o_ref.dtype)


# --------------------------------------------------------------------------
# Wrapper
# --------------------------------------------------------------------------
def self_attention(x, params, *, max_seq_tile=128):
    """x: [seq, embed] (f32 or bf16). params: W [E,E] pre-transposed, b [1,E]."""
    seq, embed = x.shape
    dtype = x.dtype

    e_p = _round_up(embed, 128)                       # lane-dense last dim
    tile = min(max_seq_tile, _round_up(seq, 8))       # sublane-aligned seq tile
    seq_p = _round_up(seq, tile)
    needs_mask = seq_p > seq

    x_p = _pad2(x, seq_p, e_p).astype(dtype)
    w = {n: _pad2(params[n], e_p, e_p).astype(dtype) for n in ("wq", "wk", "wv", "wo")}
    b = {n: _pad2(params[n], 1, e_p).astype(dtype) for n in ("bq", "bk", "bv", "bo")}

    seq_spec = pl.BlockSpec((tile, e_p), lambda i: (i, 0))
    wgt_spec = pl.BlockSpec((e_p, e_p), lambda i: (0, 0))     # resident weights
    bias_spec = pl.BlockSpec((1, e_p), lambda i: (0, 0))

    scale = 1.0 / (float(embed) ** 0.5)
    q, k, v = pl.pallas_call(
        functools.partial(qkv_proj_kernel, scale),
        grid=(seq_p // tile,),
        in_specs=[seq_spec, wgt_spec, bias_spec, wgt_spec, bias_spec,
                  wgt_spec, bias_spec],
        out_specs=(seq_spec, seq_spec, seq_spec),
        out_shape=(jax.ShapeDtypeStruct((seq_p, e_p), dtype),
                   jax.ShapeDtypeStruct((seq_p, e_p), dtype),
                   jax.ShapeDtypeStruct((seq_p, e_p), dtype)),
        compiler_params=pltpu.CompilerParams(dimension_semantics=("parallel",)),
    )(x_p, w["wq"], b["bq"], w["wk"], b["bk"], w["wv"], b["bv"])

    out = pl.pallas_call(
        functools.partial(flash_attn_kernel, seq, tile, needs_mask),
        grid=(seq_p // tile, seq_p // tile),
        in_specs=[
            pl.BlockSpec((tile, e_p), lambda qi, ki: (qi, 0)),   # q
            pl.BlockSpec((tile, e_p), lambda qi, ki: (ki, 0)),   # k
            pl.BlockSpec((tile, e_p), lambda qi, ki: (ki, 0)),   # v
            pl.BlockSpec((e_p, e_p), lambda qi, ki: (0, 0)),     # wo (resident)
            pl.BlockSpec((1, e_p), lambda qi, ki: (0, 0)),       # bo
        ],
        out_specs=pl.BlockSpec((tile, e_p), lambda qi, ki: (qi, 0)),
        out_shape=jax.ShapeDtypeStruct((seq_p, e_p), dtype),
        scratch_shapes=[
            pltpu.VMEM((tile, 1), jnp.float32),     # running max m
            pltpu.VMEM((tile, 1), jnp.float32),     # running denom l
            pltpu.VMEM((tile, e_p), jnp.float32),   # accumulator
        ],
        compiler_params=pltpu.CompilerParams(
            dimension_semantics=("parallel", "arbitrary")),
    )(q, k, v, w["wo"], b["bo"])

    return out[:seq, :embed]


# --------------------------------------------------------------------------
# Params init + pure-JAX reference
# --------------------------------------------------------------------------
def init_linear_params(key, embed):
    """Deterministic nn.Linear-style init: U(-1/sqrt(in), 1/sqrt(in))."""
    bound = 1.0 / (embed ** 0.5)
    kw, kb = jax.random.split(key)
    # Stored as [in, out] (PyTorch weight transposed) so kernels do x @ W.
    w = jax.random.uniform(kw, (embed, embed), jnp.float32, -bound, bound)
    bias = jax.random.uniform(kb, (1, embed), jnp.float32, -bound, bound)
    return w, bias


def reference_self_attention(x, params):
    embed = x.shape[1]
    q = x @ params["wq"] + params["bq"]
    k = x @ params["wk"] + params["bk"]
    v = x @ params["wv"] + params["bv"]
    energy = q @ k.T
    attn = jax.nn.softmax(energy / (embed ** 0.5), axis=1)
    out = attn @ v
    return out @ params["wo"] + params["bo"]


if __name__ == "__main__":
    seq, embed = 8, 32
    key = jax.random.PRNGKey(0)
    kx, kq, kk, kv, ko = jax.random.split(key, 5)

    x = jax.random.normal(kx, (seq, embed), jnp.float32)

    wq, bq = init_linear_params(kq, embed)
    wk, bk = init_linear_params(kk, embed)
    wv, bv = init_linear_params(kv, embed)
    wo, bo = init_linear_params(ko, embed)
    params = dict(wq=wq, bq=bq, wk=wk, bk=bk, wv=wv, bv=bv, wo=wo, bo=bo)

    ref = reference_self_attention(x, params)

    # f32 path (approx reciprocal in the softmax denominator -> slightly looser tol).
    out = jax.block_until_ready(self_attention(x, params))
    assert out.shape == (seq, embed)
    assert jnp.allclose(out, ref, atol=1e-2, rtol=1e-2), \
        f"f32 max err {float(jnp.max(jnp.abs(out - ref)))}"

    # bf16 matmul path (f32 accumulation), looser tolerance.
    x_bf = x.astype(jnp.bfloat16)
    params_bf = {n: p.astype(jnp.bfloat16) for n, p in params.items()}
    out_bf = jax.block_until_ready(self_attention(x_bf, params_bf))
    out_bf = out_bf.astype(jnp.float32)
    assert jnp.allclose(out_bf, ref, atol=5e-2, rtol=5e-2), \
        f"bf16 max err {float(jnp.max(jnp.abs(out_bf - ref)))}"

    print("KERNEL_OK")
</pallas_src>

<mosaic_0001>
module attributes {stable_mosaic.version = 11 : i64} {
  func.func @qkv_proj_kernel(%arg0: i32, %arg1: memref<8x128xf32, #tpu.memory_space<vmem>>, %arg2: memref<128x128xf32, #tpu.memory_space<vmem>>, %arg3: memref<1x128xf32, #tpu.memory_space<vmem>>, %arg4: memref<128x128xf32, #tpu.memory_space<vmem>>, %arg5: memref<1x128xf32, #tpu.memory_space<vmem>>, %arg6: memref<128x128xf32, #tpu.memory_space<vmem>>, %arg7: memref<1x128xf32, #tpu.memory_space<vmem>>, %arg8: memref<8x128xf32, #tpu.memory_space<vmem>>, %arg9: memref<8x128xf32, #tpu.memory_space<vmem>>, %arg10: memref<8x128xf32, #tpu.memory_space<vmem>>) attributes {dimension_semantics = [#tpu.dimension_semantics<parallel>], iteration_bounds = array<i64: 1>, scalar_prefetch = 0 : i64, scratch_operands = 0 : i64, tpu.core_type = #tpu.core_type<tc>, window_params = [{transform_indices = @transform_0, window_bounds = array<i64: 8, 128>}, {pipeline_mode = #tpu.pipeline_mode<synchronous>, transform_indices = @transform_1, window_bounds = array<i64: 128, 128>}, {pipeline_mode = #tpu.pipeline_mode<synchronous>, transform_indices = @transform_2, window_bounds = array<i64: 1, 128>}, {pipeline_mode = #tpu.pipeline_mode<synchronous>, transform_indices = @transform_3, window_bounds = array<i64: 128, 128>}, {pipeline_mode = #tpu.pipeline_mode<synchronous>, transform_indices = @transform_4, window_bounds = array<i64: 1, 128>}, {pipeline_mode = #tpu.pipeline_mode<synchronous>, transform_indices = @transform_5, window_bounds = array<i64: 128, 128>}, {pipeline_mode = #tpu.pipeline_mode<synchronous>, transform_indices = @transform_6, window_bounds = array<i64: 1, 128>}, {transform_indices = @transform_7, window_bounds = array<i64: 8, 128>}, {transform_indices = @transform_8, window_bounds = array<i64: 8, 128>}, {transform_indices = @transform_9, window_bounds = array<i64: 8, 128>}]} {
    %c0 = arith.constant 0 : index
    %c0_0 = arith.constant 0 : index
    %0 = vector.load %arg1[%c0, %c0_0] : memref<8x128xf32, #tpu.memory_space<vmem>>, vector<8x128xf32>
    %c0_1 = arith.constant 0 : index
    %c0_2 = arith.constant 0 : index
    %1 = vector.load %arg2[%c0_1, %c0_2] : memref<128x128xf32, #tpu.memory_space<vmem>>, vector<128x128xf32>
    %cst = arith.constant dense<0.000000e+00> : vector<8x128xf32>
    %2 = tpu.matmul %0, %1, %cst {dimension_numbers = #tpu.dot_dimension_numbers<[1], [0], [0], [1], [0, 0, 1, 1], [], []>} : vector<8x128xf32>, vector<128x128xf32>, vector<8x128xf32> -> vector<8x128xf32>
    %c0_3 = arith.constant 0 : index
    %c0_4 = arith.constant 0 : index
    %3 = vector.load %arg3[%c0_3, %c0_4] : memref<1x128xf32, #tpu.memory_space<vmem>>, vector<1x128xf32>
    %4 = vector.broadcast %3 : vector<1x128xf32> to vector<8x128xf32>
    %5 = arith.addf %2, %4 : vector<8x128xf32>
    %c0_5 = arith.constant 0 : index
    %c0_6 = arith.constant 0 : index
    %6 = vector.load %arg4[%c0_5, %c0_6] : memref<128x128xf32, #tpu.memory_space<vmem>>, vector<128x128xf32>
    %cst_7 = arith.constant dense<0.000000e+00> : vector<8x128xf32>
    %7 = tpu.matmul %0, %6, %cst_7 {dimension_numbers = #tpu.dot_dimension_numbers<[1], [0], [0], [1], [0, 0, 1, 1], [], []>} : vector<8x128xf32>, vector<128x128xf32>, vector<8x128xf32> -> vector<8x128xf32>
    %c0_8 = arith.constant 0 : index
    %c0_9 = arith.constant 0 : index
    %8 = vector.load %arg5[%c0_8, %c0_9] : memref<1x128xf32, #tpu.memory_space<vmem>>, vector<1x128xf32>
    %9 = vector.broadcast %8 : vector<1x128xf32> to vector<8x128xf32>
    %10 = arith.addf %7, %9 : vector<8x128xf32>
    %c0_10 = arith.constant 0 : index
    %c0_11 = arith.constant 0 : index
    %11 = vector.load %arg6[%c0_10, %c0_11] : memref<128x128xf32, #tpu.memory_space<vmem>>, vector<128x128xf32>
    %cst_12 = arith.constant dense<0.000000e+00> : vector<8x128xf32>
    %12 = tpu.matmul %0, %11, %cst_12 {dimension_numbers = #tpu.dot_dimension_numbers<[1], [0], [0], [1], [0, 0, 1, 1], [], []>} : vector<8x128xf32>, vector<128x128xf32>, vector<8x128xf32> -> vector<8x128xf32>
    %c0_13 = arith.constant 0 : index
    %c0_14 = arith.constant 0 : index
    %13 = vector.load %arg7[%c0_13, %c0_14] : memref<1x128xf32, #tpu.memory_space<vmem>>, vector<1x128xf32>
    %14 = vector.broadcast %13 : vector<1x128xf32> to vector<8x128xf32>
    %15 = arith.addf %12, %14 : vector<8x128xf32>
    %cst_15 = arith.constant 0.176776692 : f32
    %16 = vector.broadcast %cst_15 : f32 to vector<8x128xf32>
    %17 = arith.mulf %5, %16 : vector<8x128xf32>
    %c0_16 = arith.constant 0 : index
    %c0_17 = arith.constant 0 : index
    %18 = vector.load %arg8[%c0_16, %c0_17] : memref<8x128xf32, #tpu.memory_space<vmem>>, vector<8x128xf32>
    tpu.vector_store %arg8[%c0_16, %c0_17], %17 {strides = array<i32>} : memref<8x128xf32, #tpu.memory_space<vmem>>, vector<8x128xf32>,
    %c0_18 = arith.constant 0 : index
    %c0_19 = arith.constant 0 : index
    %19 = vector.load %arg9[%c0_18, %c0_19] : memref<8x128xf32, #tpu.memory_space<vmem>>, vector<8x128xf32>
    tpu.vector_store %arg9[%c0_18, %c0_19], %10 {strides = array<i32>} : memref<8x128xf32, #tpu.memory_space<vmem>>, vector<8x128xf32>,
    %c0_20 = arith.constant 0 : index
    %c0_21 = arith.constant 0 : index
    %20 = vector.load %arg10[%c0_20, %c0_21] : memref<8x128xf32, #tpu.memory_space<vmem>>, vector<8x128xf32>
    tpu.vector_store %arg10[%c0_20, %c0_21], %15 {strides = array<i32>} : memref<8x128xf32, #tpu.memory_space<vmem>>, vector<8x128xf32>,
    return
  }
  func.func @transform_0(%arg0: i32) -> (i32, i32) {
    %c0_i32 = arith.constant 0 : i32
    %c0_i32_0 = arith.constant 0 : i32
    return %arg0, %c0_i32 : i32, i32
  }
  func.func @transform_1(%arg0: i32) -> (i32, i32) {
    %c0_i32 = arith.constant 0 : i32
    %c0_i32_0 = arith.constant 0 : i32
    %c0_i32_1 = arith.constant 0 : i32
    return %c0_i32, %c0_i32_0 : i32, i32
  }
  func.func @transform_2(%arg0: i32) -> (i32, i32) {
    %c0_i32 = arith.constant 0 : i32
    %c0_i32_0 = arith.constant 0 : i32
    %c0_i32_1 = arith.constant 0 : i32
    return %c0_i32, %c0_i32_0 : i32, i32
  }
  func.func @transform_3(%arg0: i32) -> (i32, i32) {
    %c0_i32 = arith.constant 0 : i32
    %c0_i32_0 = arith.constant 0 : i32
    %c0_i32_1 = arith.constant 0 : i32
    return %c0_i32, %c0_i32_0 : i32, i32
  }
  func.func @transform_4(%arg0: i32) -> (i32, i32) {
    %c0_i32 = arith.constant 0 : i32
    %c0_i32_0 = arith.constant 0 : i32
    %c0_i32_1 = arith.constant 0 : i32
    return %c0_i32, %c0_i32_0 : i32, i32
  }
  func.func @transform_5(%arg0: i32) -> (i32, i32) {
    %c0_i32 = arith.constant 0 : i32
    %c0_i32_0 = arith.constant 0 : i32
    %c0_i32_1 = arith.constant 0 : i32
    return %c0_i32, %c0_i32_0 : i32, i32
  }
  func.func @transform_6(%arg0: i32) -> (i32, i32) {
    %c0_i32 = arith.constant 0 : i32
    %c0_i32_0 = arith.constant 0 : i32
    %c0_i32_1 = arith.constant 0 : i32
    return %c0_i32, %c0_i32_0 : i32, i32
  }
  func.func @transform_7(%arg0: i32) -> (i32, i32) {
    %c0_i32 = arith.constant 0 : i32
    %c0_i32_0 = arith.constant 0 : i32
    return %arg0, %c0_i32 : i32, i32
  }
  func.func @transform_8(%arg0: i32) -> (i32, i32) {
    %c0_i32 = arith.constant 0 : i32
    %c0_i32_0 = arith.constant 0 : i32
    return %arg0, %c0_i32 : i32, i32
  }
  func.func @transform_9(%arg0: i32) -> (i32, i32) {
    %c0_i32 = arith.constant 0 : i32
    %c0_i32_0 = arith.constant 0 : i32
    return %arg0, %c0_i32 : i32, i32
  }
}

</mosaic_0001>

<bundles_post_ra>
// kernel: tpu_custom_call.1
= control target key start
LH: loop header
LB: loop body
LE: loop exit
PB: predicated region body
PF: predicated region fallthrough
CT: control target
= control target key end

     0   :  { %15 = vsyncpa [#allocation3], 0  ;;  %s891_s0 = inlined_call_operand.hbm [shape: f32[8,128], index: 0, kind: input, shape index: {}]   ;;  %s892_s1 = inlined_call_operand.hbm [shape: f32[128,128], index: 1, kind: input, shape index: {}]   ;;  %s893_s2 = inlined_call_operand.vmem [shape: f32[1,128], index: 2, kind: input, shape index: {}]   ;;  %s894_s3 = inlined_call_operand.hbm [shape: f32[128,128], index: 3, kind: input, shape index: {}]   ;;  %s895_s4 = inlined_call_operand.vmem [shape: f32[1,128], index: 4, kind: input, shape index: {}]   ;;  %s896_s5 = inlined_call_operand.hbm [shape: f32[128,128], index: 5, kind: input, shape index: {}]   ;;  %s897_s6 = inlined_call_operand.vmem [shape: f32[1,128], index: 6, kind: input, shape index: {}]   ;;  %s898_s7 = inlined_call_operand.hbm [shape: f32[8,128], index: 7, kind: output, shape index: {0}]   ;;  %s899_s8 = inlined_call_operand.hbm [shape: f32[8,128], index: 8, kind: output, shape index: {1}]   ;;  %s900_s9 = inlined_call_operand.hbm [shape: f32[8,128], index: 9, kind: output, shape index: {2}]  }
   0x1   :  { %16 = vsyncpa [#allocation6], 0 }
   0x2   :  { %17 = vsyncpa [#allocation9], 0 }
   0x3   :  { %18 = vsyncpa [#allocation4], 0 }
   0x4   :  { %19 = vsyncpa [#allocation12], 0  ;;  %s732_s30 = smov [#allocation5]  }
   0x5   :  { %s35_s10 = sshll.u32 %s732_s30, 4  ;;  %s36_s10 = int_to_ptr.vmem [resolvable:$true] %s35_s10 }
   0x6   :  { %s590_s11 = scalar_lea.vmem %s36_s10, 2048  ;;  %p595_p1 = scmp.lt.s32.totalorder %s36_s10, %s36_s10 }
   0x7   :  { %p591_p0 = scmp.ne.s32.totalorder %s36_s10, %s590_s11  ;;  %p596_p2 = scmp.lt.s32.totalorder %s590_s11, %s590_s11 }
   0x9   :  { %p597_p3 = por %p596_p2, %p595_p1 }
   0xb   :  { %p598_p4 = pnand %p597_p3, %p591_p0 }
   0xd   :  { %601 = shalt.err (!%p598_p4)
}
   0xe   :  { %s733_s12 = smov 128   ;;  %s734_s13 = smov 8  }
   0xf   :  { %41 = dma.hbm_to_vmem [thread:$0]  %s892_s1, 2048, %s36_s10, [#allocation6], %s733_s12, %s733_s12, %s734_s13  }
  0x10   :  { %s735_s16 = smov [#allocation2]   ;;  %s736_s18 = smov [#allocation7]  }
  0x11   :  { %s26_s17 = sshll.u32 %s735_s16, 4  ;;  %s49_s19 = sshll.u32 %s736_s18, 4  ;;  %s27_s17 = int_to_ptr.vmem [resolvable:$true] %s26_s17  ;;  %s50_s19 = int_to_ptr.vmem [resolvable:$true] %s49_s19 }
  0x12   :  { %s610_s20 = scalar_lea.vmem %s27_s17, 128  ;;  %p615_p6 = scmp.lt.s32.totalorder %s27_s17, %s27_s17 }
  0x13   :  { %p611_p5 = scmp.ne.s32.totalorder %s27_s17, %s610_s20  ;;  %p616_p7 = scmp.lt.s32.totalorder %s610_s20, %s610_s20 }
  0x15   :  { %p617_p8 = por %p616_p7, %p615_p6 }
  0x17   :  { %p618_p9 = pnand %p617_p8, %p611_p5 }
  0x19   :  { %621 = shalt.err (!%p618_p9)
}
  0x1a   :  { %29 = dma.hbm_to_vmem [thread:$0]  %s891_s0, 128, %s27_s17, [#allocation3]  }
  0x1b   :  { %s630_s23 = scalar_lea.vmem %s50_s19, 2048  ;;  %p635_p11 = scmp.lt.s32.totalorder %s50_s19, %s50_s19 }
  0x1c   :  { %p631_p10 = scmp.ne.s32.totalorder %s50_s19, %s630_s23  ;;  %p636_p12 = scmp.lt.s32.totalorder %s630_s23, %s630_s23 }
  0x1e   :  { %p637_p13 = por %p636_p12, %p635_p11 }
  0x20   :  { %p638_p0 = pnand %p637_p13, %p631_p10 }
  0x22   :  { %641 = shalt.err (!%p638_p0)
}
  0x23   :  { %55 = dma.hbm_to_vmem [thread:$0]  %s894_s3, 2048, %s50_s19, [#allocation6], %s733_s12, %s733_s12, %s734_s13  }
  0x24   :  { %s737_s25 = smov [#allocation8]  }
  0x25   :  { %s63_s26 = sshll.u32 %s737_s25, 4  ;;  %s64_s26 = int_to_ptr.vmem [resolvable:$true] %s63_s26 }
  0x26   :  { %s650_s27 = scalar_lea.vmem %s64_s26, 2048  ;;  %p655_p2 = scmp.lt.s32.totalorder %s64_s26, %s64_s26 }
  0x27   :  { %p651_p1 = scmp.ne.s32.totalorder %s64_s26, %s650_s27  ;;  %p656_p3 = scmp.lt.s32.totalorder %s650_s27, %s650_s27 }
  0x29   :  { %p657_p4 = por %p656_p3, %p655_p2 }
  0x2b   :  { %p658_p5 = pnand %p657_p4, %p651_p1 }
  0x2d   :  { %661 = shalt.err (!%p658_p5)
}
  0x2e   :  { %69 = dma.hbm_to_vmem [thread:$0]  %s896_s5, 2048, %s64_s26, [#allocation9], %s733_s12, %s733_s12, %s734_s13  }
  0x2f   :  { %722 = dma.done.wait [#allocation3], 128  }
  0x30   :  { %723 = vsyncadd [#allocation3], 4294967168 }
  0x31   :  { %724 = dma.done.wait [#allocation6], 4096  }
  0x32   :  { %725 = vsyncadd [#allocation6], 4294963200 }
  0x33   :  { %726 = dma.done.wait [#allocation9], 2048  }
  0x34   :  { %727 = vsyncadd [#allocation9], 4294965248  ;;  %v738_v0 = vmov 0.0   ;;  %vm739_vm0 = vmmov 0   ;;  %v100_v1 = vld [vmem:[#allocation5 + $0x78] sm:$0xff]  ;;  %v99_v2 = vld [vmem:[#allocation5 + $0x70] sm:$0xff] }
  0x35   :  { %466 = vmatprep.subr.mxu0 %v738_v0  ;;  %501 = vmatprep.subr.mxu1 %v738_v0  ;;  %v98_v3 = vld [vmem:[#allocation5 + $0x68] sm:$0xff]  ;;  %v97_v4 = vld [vmem:[#allocation5 + $0x60] sm:$0xff]  ;;  %v193_v5 = vld [vmem:[#allocation7 + $0x78] sm:$0xff]  ;;  %s740_s29 = smov [#allocation10]   ;;  %s741_s12 = smov [#allocation11]  }
  0x36   :  { %498 = vmatprep.mubr.msk.f32.mxu0 %vm739_vm0, %v738_v0  ;;  %533 = vmatprep.mubr.msk.f32.mxu1 %vm739_vm0, %v738_v0  ;;  %v96_v6 = vld [vmem:[#allocation5 + $0x58] sm:$0xff]  ;;  %v192_v7 = vld [vmem:[#allocation7 + $0x70] sm:$0xff]  ;;  %v191_v8 = vld [vmem:[#allocation7 + $0x68] sm:$0xff]  ;;  %s374_s30 = sshll.u32 %s740_s29, 4  ;;  %s384_s13 = sshll.u32 %s741_s12, 4  ;;  %s375_s30 = int_to_ptr.vmem [resolvable:$true] %s374_s30  ;;  %s385_s13 = int_to_ptr.vmem [resolvable:$true] %s384_s13 }
  0x37   :  { %467 = vmatpush3.msra.mxu0 %v100_v1  ;;  %502 = vmatpush3.msra.mxu1 %v193_v5  ;;  %v95_v9 = vld [vmem:[#allocation5 + $0x50] sm:$0xff]  ;;  %v190_v10 = vld [vmem:[#allocation7 + $0x60] sm:$0xff]  ;;  %v94_v11 = vld [vmem:[#allocation5 + $0x48] sm:$0xff]  ;;  %s662_s14 = scalar_lea.vmem %s375_s30, 128  ;;  %p667_p7 = scmp.lt.s32.totalorder %s375_s30, %s375_s30 }
  0x38   :  { %468 = vmatprep.subr.mxu0 %v738_v0  ;;  %503 = vmatprep.subr.mxu1 %v738_v0  ;;  %v189_v12 = vld [vmem:[#allocation7 + $0x58] sm:$0xff]  ;;  %v93_v13 = vld [vmem:[#allocation5 + $0x40] sm:$0xff]  ;;  %v188_v14 = vld [vmem:[#allocation7 + $0x50] sm:$0xff]  ;;  %p663_p6 = scmp.ne.s32.totalorder %s375_s30, %s662_s14  ;;  %p668_p8 = scmp.lt.s32.totalorder %s662_s14, %s662_s14 }
  0x39   :  { %469 = vmatpush3.msra.mxu0 %v99_v2  ;;  %504 = vmatpush3.msra.mxu1 %v192_v7  ;;  %v92_v15 = vld [vmem:[#allocation5 + $0x38] sm:$0xff]  ;;  %v187_v16 = vld [vmem:[#allocation7 + $0x48] sm:$0xff]  ;;  %v91_v17 = vld [vmem:[#allocation5 + $0x30] sm:$0xff] }
  0x3a   :  { %470 = vmatprep.subr.mxu0 %v738_v0  ;;  %505 = vmatprep.subr.mxu1 %v738_v0  ;;  %v186_v18 = vld [vmem:[#allocation7 + $0x40] sm:$0xff]  ;;  %v90_v19 = vld [vmem:[#allocation5 + $0x28] sm:$0xff]  ;;  %v185_v20 = vld [vmem:[#allocation7 + $0x38] sm:$0xff]  ;;  %p669_p9 = por %p668_p8, %p667_p7 }
  0x3b   :  { %471 = vmatpush3.msra.mxu0 %v98_v3  ;;  %506 = vmatpush3.msra.mxu1 %v191_v8  ;;  %v89_v21 = vld [vmem:[#allocation5 + $0x20] sm:$0xff]  ;;  %v184_v22 = vld [vmem:[#allocation7 + $0x30] sm:$0xff]  ;;  %v88_v23 = vld [vmem:[#allocation5 + $0x18] sm:$0xff] }
  0x3c   :  { %472 = vmatprep.subr.mxu0 %v738_v0  ;;  %507 = vmatprep.subr.mxu1 %v738_v0  ;;  %v183_v24 = vld [vmem:[#allocation7 + $0x28] sm:$0xff]  ;;  %v87_v25 = vld [vmem:[#allocation5 + $0x10] sm:$0xff]  ;;  %v182_v26 = vld [vmem:[#allocation7 + $0x20] sm:$0xff]  ;;  %p670_p10 = pnand %p669_p9, %p663_p6 }
  0x3d   :  { %473 = vmatpush3.msra.mxu0 %v97_v4  ;;  %508 = vmatpush3.msra.mxu1 %v190_v10  ;;  %v86_v27 = vld [vmem:[#allocation5 + $0x8] sm:$0xff]  ;;  %v181_v28 = vld [vmem:[#allocation7 + $0x18] sm:$0xff]  ;;  %v85_v29 = vld [vmem:[#allocation5] sm:$0xff] }
  0x3e   :  { %474 = vmatprep.subr.mxu0 %v738_v0  ;;  %509 = vmatprep.subr.mxu1 %v738_v0  ;;  %v845_v30 = vld [vmem:[#allocation2] sm:$0xff]  ;;  %v180_v32 = vld [vmem:[#allocation7 + $0x10] sm:$0xff]  ;;  %v179_v34 = vld [vmem:[#allocation7 + $0x8] sm:$0xff] }
  0x3f   :  { %475 = vmatpush3.msra.mxu0 %v96_v6  ;;  %510 = vmatpush3.msra.mxu1 %v189_v12  ;;  %v286_v31 = vld [vmem:[#allocation8 + $0x78] sm:$0xff]  ;;  %v285_v33 = vld [vmem:[#allocation8 + $0x70] sm:$0xff]  ;;  %v284_v35 = vld [vmem:[#allocation8 + $0x68] sm:$0xff] }
  0x40   :  { %476 = vmatprep.subr.mxu0 %v738_v0  ;;  %511 = vmatprep.subr.mxu1 %v738_v0  ;;  %v178_v36 = vld [vmem:[#allocation7] sm:$0xff]  ;;  %v282_v38 = vld [vmem:[#allocation8 + $0x58] sm:$0xff]  ;;  %v281_v39 = vld [vmem:[#allocation8 + $0x50] sm:$0xff] }
  0x41   :  { %477 = vmatpush3.msra.mxu0 %v95_v9  ;;  %512 = vmatpush3.msra.mxu1 %v188_v14  ;;  %v283_v37 = vld [vmem:[#allocation8 + $0x60] sm:$0xff]  ;;  %v280_v40 = vld [vmem:[#allocation8 + $0x48] sm:$0xff]  ;;  %v278_v42 = vld [vmem:[#allocation8 + $0x38] sm:$0xff] }
  0x42   :  { %478 = vmatprep.subr.mxu0 %v738_v0  ;;  %513 = vmatprep.subr.mxu1 %v738_v0  ;;  %v279_v41 = vld [vmem:[#allocation8 + $0x40] sm:$0xff]  ;;  %v277_v43 = vld [vmem:[#allocation8 + $0x30] sm:$0xff]  ;;  %v276_v44 = vld [vmem:[#allocation8 + $0x28] sm:$0xff] }
  0x43   :  { %479 = vmatpush3.msra.mxu0 %v94_v11  ;;  %514 = vmatpush3.msra.mxu1 %v187_v16  ;;  %v275_v45 = vld [vmem:[#allocation8 + $0x20] sm:$0xff]  ;;  %v274_v46 = vld [vmem:[#allocation8 + $0x18] sm:$0xff]  ;;  %v273_v47 = vld [vmem:[#allocation8 + $0x10] sm:$0xff] }
  0x44   :  { %480 = vmatprep.subr.mxu0 %v738_v0  ;;  %515 = vmatprep.subr.mxu1 %v738_v0  ;;  %v272_v48 = vld [vmem:[#allocation8 + $0x8] sm:$0xff]  ;;  %v271_v49 = vld [vmem:[#allocation8] sm:$0xff]  ;;  %v412_v50 = vld [vmem:[%s893_s2] ss:$0 sm:$0xff] }
  0x45   :  { %481 = vmatpush3.msra.mxu0 %v93_v13  ;;  %516 = vmatpush3.msra.mxu1 %v186_v18  ;;  %v413_v55 = vld [vmem:[%s895_s4] ss:$0 sm:$0xff] }
  0x46   :  { %482 = vmatprep.subr.mxu0 %v738_v0  ;;  %517 = vmatprep.subr.mxu1 %v738_v0 }
  0x47   :  { %483 = vmatpush3.msra.mxu0 %v92_v15  ;;  %518 = vmatpush3.msra.mxu1 %v185_v20 }
  0x48   :  { %484 = vmatprep.subr.mxu0 %v738_v0  ;;  %519 = vmatprep.subr.mxu1 %v738_v0 }
  0x49   :  { %485 = vmatpush3.msra.mxu0 %v91_v17  ;;  %520 = vmatpush3.msra.mxu1 %v184_v22 }
  0x4a   :  { %486 = vmatprep.subr.mxu0 %v738_v0  ;;  %521 = vmatprep.subr.mxu1 %v738_v0 }
  0x4b   :  { %487 = vmatpush3.msra.mxu0 %v90_v19  ;;  %522 = vmatpush3.msra.mxu1 %v183_v24 }
  0x4c   :  { %488 = vmatprep.subr.mxu0 %v738_v0  ;;  %523 = vmatprep.subr.mxu1 %v738_v0 }
  0x4d   :  { %489 = vmatpush3.msra.mxu0 %v89_v21  ;;  %524 = vmatpush3.msra.mxu1 %v182_v26 }
  0x4e   :  { %490 = vmatprep.subr.mxu0 %v738_v0  ;;  %525 = vmatprep.subr.mxu1 %v738_v0 }
  0x4f   :  { %491 = vmatpush3.msra.mxu0 %v88_v23  ;;  %526 = vmatpush3.msra.mxu1 %v181_v28 }
  0x50   :  { %492 = vmatprep.subr.mxu0 %v738_v0  ;;  %527 = vmatprep.subr.mxu1 %v738_v0 }
  0x51   :  { %493 = vmatpush3.msra.mxu0 %v87_v25  ;;  %528 = vmatpush3.msra.mxu1 %v180_v32 }
  0x52   :  { %494 = vmatprep.subr.mxu0 %v738_v0  ;;  %529 = vmatprep.subr.mxu1 %v738_v0 }
  0x53   :  { %495 = vmatpush3.msra.mxu0 %v86_v27  ;;  %530 = vmatpush3.msra.mxu1 %v179_v34 }
  0x54   :  { %496 = vmatprep.subr.mxu0 %v738_v0  ;;  %531 = vmatprep.subr.mxu1 %v738_v0 }
  0x55   :  { %497 = vmatpush3.msra.mxu0 %v85_v29  ;;  %532 = vmatpush3.msra.mxu1 %v178_v36 }
  0x56   :  { %499 = vmatmul.mubr.f32.vlgmr.msra.gmra.mxu0 %v845_v30  ;;  %536 = vmatprep.subr.mxu0 %v738_v0 }
  0x57   :  { %537 = vmatpush3.msra.mxu0 %v286_v31  ;;  %534 = vmatmul.mubr.f32.vlgmr.msra.gmra.mxu1 %v845_v30 }
  0x58   :  { %538 = vmatprep.subr.mxu0 %v738_v0  ;;  %568 = vmatprep.mubr.msk.f32.mxu0 %vm739_vm0, %v738_v0 }
  0x59   :  { %539 = vmatpush3.msra.mxu0 %v285_v33 }
  0x5a   :  { %540 = vmatprep.subr.mxu0 %v738_v0 }
  0x5b   :  { %541 = vmatpush3.msra.mxu0 %v284_v35 }
  0x5c   :  { %542 = vmatprep.subr.mxu0 %v738_v0 }
  0x5d   :  { %543 = vmatpush3.msra.mxu0 %v283_v37 }
  0x5e   :  { %544 = vmatprep.subr.mxu0 %v738_v0 }
  0x5f   :  { %545 = vmatpush3.msra.mxu0 %v282_v38 }
  0x60   :  { %546 = vmatprep.subr.mxu0 %v738_v0 }
  0x61   :  { %547 = vmatpush3.msra.mxu0 %v281_v39 }
  0x62   :  { %548 = vmatprep.subr.mxu0 %v738_v0 }
  0x63   :  { %549 = vmatpush3.msra.mxu0 %v280_v40 }
  0x64   :  { %550 = vmatprep.subr.mxu0 %v738_v0 }
  0x65   :  { %551 = vmatpush3.msra.mxu0 %v279_v41 }
  0x66   :  { %552 = vmatprep.subr.mxu0 %v738_v0 }
  0x67   :  { %553 = vmatpush3.msra.mxu0 %v278_v42 }
  0x68   :  { %554 = vmatprep.subr.mxu0 %v738_v0 }
  0x69   :  { %555 = vmatpush3.msra.mxu0 %v277_v43 }
  0x6a   :  { %556 = vmatprep.subr.mxu0 %v738_v0 }
  0x6b   :  { %557 = vmatpush3.msra.mxu0 %v276_v44 }
  0x6c   :  { %558 = vmatprep.subr.mxu0 %v738_v0 }
  0x6d   :  { %559 = vmatpush3.msra.mxu0 %v275_v45 }
  0x6e   :  { %560 = vmatprep.subr.mxu0 %v738_v0 }
  0x6f   :  { %561 = vmatpush3.msra.mxu0 %v274_v46 }
  0x70   :  { %562 = vmatprep.subr.mxu0 %v738_v0 }
  0x71   :  { %563 = vmatpush3.msra.mxu0 %v273_v47 }
  0x72   :  { %564 = vmatprep.subr.mxu0 %v738_v0 }
  0x73   :  { %565 = vmatpush3.msra.mxu0 %v272_v48 }
  0x74   :  { %566 = vmatprep.subr.mxu0 %v738_v0 }
  0x75   :  { %567 = vmatpush3.msra.mxu0 %v271_v49 }
  0x76   :  { %569 = vmatmul.mubr.f32.vlgmr.msra.gmra.mxu0 %v845_v30 }
 0x116   :  { %v174_v51 = vpop.f32.mrf.mxu0 }
 0x117   :  { %v175_v52 = vadd.f32 %v412_v50, %v174_v51  ;;  %v267_v56 = vpop.f32.mrf.mxu1 }
 0x118   :  { %v500_v53 = vpop.f32.mrf.mxu0 }
 0x119   :  { %v364_v54 = vmul.f32 0.17677669, %v175_v52 }
 0x11b   :  { %365 = vst [vmem:[#allocation10] sm:$0xff] %v364_v54 }
 0x11c   :  { %673 = shalt.err (!%p670_p10)
}
 0x11d   :  { %377 = dma.vmem_to_hbm [thread:$0]  %s375_s30, 128, %s898_s7, [#allocation4]   ;;  %v268_v57 = vadd.f32 %v413_v55, %v267_v56  ;;  %v535_v58 = vpop.f32.mrf.mxu1 }
 0x11e   :  { %s682_s4 = scalar_lea.vmem %s385_s13, 128  ;;  %p687_p12 = scmp.lt.s32.totalorder %s385_s13, %s385_s13 }
 0x11f   :  { %366 = vst [vmem:[#allocation11] sm:$0xff] %v268_v57  ;;  %p683_p11 = scmp.ne.s32.totalorder %s385_s13, %s682_s4  ;;  %p688_p13 = scmp.lt.s32.totalorder %s682_s4, %s682_s4 }
 0x121   :  { %p689_p0 = por %p688_p13, %p687_p12 }
 0x123   :  { %p690_p1 = pnand %p689_p0, %p683_p11 }
 0x125   :  { %693 = shalt.err (!%p690_p1)
}
 0x126   :  { %387 = dma.vmem_to_hbm [thread:$0]  %s385_s13, 128, %s899_s8, [#allocation12]   ;;  %v414_v59 = vld [vmem:[%s897_s6] ss:$0 sm:$0xff] }
 0x127   :  { %s742_s7 = smov [#allocation13]  }
 0x128   :  { %s394_s20 = sshll.u32 %s742_s7, 4  ;;  %s395_s20 = int_to_ptr.vmem [resolvable:$true] %s394_s20 }
 0x129   :  { %s702_s21 = scalar_lea.vmem %s395_s20, 128  ;;  %p707_p3 = scmp.lt.s32.totalorder %s395_s20, %s395_s20 }
 0x12a   :  { %p703_p2 = scmp.ne.s32.totalorder %s395_s20, %s702_s21  ;;  %p708_p4 = scmp.lt.s32.totalorder %s702_s21, %s702_s21 }
 0x12c   :  { %p709_p5 = por %p708_p4, %p707_p3 }
 0x12e   :  { %p710_p6 = pnand %p709_p5, %p703_p2 }
 0x136   :  { %v360_v60 = vpop.f32.mrf.mxu0 }
 0x137   :  { %v361_v61 = vadd.f32 %v414_v59, %v360_v60 }
 0x138   :  { %v570_v62 = vpop.f32.mrf.mxu0 }
 0x139   :  { %367 = vst [vmem:[#allocation13] sm:$0xff] %v361_v61 }
 0x13a   :  { %713 = shalt.err (!%p710_p6)
}
 0x13b   :  { %397 = dma.vmem_to_hbm [thread:$0]  %s395_s20, 128, %s900_s9, [#allocation12]  }
 0x13c   :  { %728 = dma.done.wait [#allocation4], 128  }
 0x13d   :  { %729 = vsyncadd [#allocation4], 4294967168 }
 0x13e   :  { %730 = dma.done.wait [#allocation12], 256  }
 0x13f   :  { %731 = vsyncadd [#allocation12], 4294967040 }
 0x140   :  { %407 = vsyncpa [#allocation3], 1 }
 0x141   :  { %408 = vsyncpa [#allocation6], 1 }
 0x142   :  { %409 = vsyncpa [#allocation9], 1 }
 0x143   :  { %410 = vsyncpa [#allocation4], 1 }
 0x144   :  { %411 = vsyncpa [#allocation12], 1 }

</bundles_post_ra>
